<compile_context>
chip_gen: v7x
topology: tpu7x:2x2x1
jax: 0.10.0
libtpu: 0.0.40
codegen_flags: <defaults>
</compile_context>

<pallas_src>
import numpy as np
import jax
import jax.numpy as jnp
from jax.experimental import pallas as pl
from jax.experimental.pallas import tpu as pltpu

SPP_SIZES = (1, 3, 6, 8)


# --------------------- pooling-matrix construction (host) ------------------ #
def _bin_matrix(in_size, out_size):
    """(out_size, in_size) averaging matrix with PyTorch AdaptiveAvgPool bins."""
    m = np.zeros((out_size, in_size), np.float32)
    for i in range(out_size):
        start = (i * in_size) // out_size
        end = -(-((i + 1) * in_size) // out_size)          # ceil((i+1)*in/out)
        m[i, start:end] = 1.0 / (end - start)
    return m


def _spp_matrix(H, W, sizes=SPP_SIZES):
    """(H*W, sum(s*s)) matrix M such that x.reshape(C, H*W) @ M == SPP(x)."""
    blocks = [np.kron(_bin_matrix(H, s), _bin_matrix(W, s)) for s in sizes]
    return jnp.asarray(np.concatenate(blocks, axis=0).T)    # (H*W, K_total)


# ------------------------------ Pallas kernel ------------------------------ #
def _spp_kernel(x_ref, m_ref, o_ref):
    # x_ref: (1, C, H*W)  m_ref: (H*W, K)  o_ref: (1, C, K)
    o_ref[0] = jnp.dot(x_ref[0], m_ref[...],
                       preferred_element_type=jnp.float32)


# -------------------------------- Wrapper ----------------------------------- #
def spp_block(x, sizes=SPP_SIZES):
    """x: (N, C, H, W) -> (N, C, sum(s*s)); matches _SPPblock.forward."""
    N, C, H, W = x.shape
    K = sum(s * s for s in sizes)

    x_flat = x.reshape(N, C, H * W).astype(jnp.float32)      # lane dim = H*W
    m = _spp_matrix(H, W, sizes)                             # (H*W, K)

    return pl.pallas_call(
        _spp_kernel,
        out_shape=jax.ShapeDtypeStruct((N, C, K), jnp.float32),
        grid_spec=pltpu.PrefetchScalarGridSpec(
            num_scalar_prefetch=0,
            grid=(N,),
            in_specs=[
                pl.BlockSpec((1, C, H * W), lambda n: (n, 0, 0)),
                pl.BlockSpec((H * W, K), lambda n: (0, 0)),
            ],
            out_specs=pl.BlockSpec((1, C, K), lambda n: (n, 0, 0)),
        ),
        compiler_params=pltpu.CompilerParams(
            dimension_semantics=("parallel",)),
    )(x_flat, m)


# -------------------------- Pure-JAX reference ----------------------------- #
def _adaptive_avg_pool2d_ref(x, s):
    """Explicit slice+mean implementation with PyTorch bin boundaries."""
    _, _, H, W = x.shape
    rows = []
    for i in range(s):
        hs, he = (i * H) // s, -(-((i + 1) * H) // s)
        cols = []
        for j in range(s):
            ws, we = (j * W) // s, -(-((j + 1) * W) // s)
            cols.append(jnp.mean(x[:, :, hs:he, ws:we], axis=(2, 3)))
        rows.append(jnp.stack(cols, axis=-1))
    return jnp.stack(rows, axis=-2)                          # (N, C, s, s)


def spp_block_ref(x, sizes=SPP_SIZES):
    N, C = x.shape[:2]
    priors = [_adaptive_avg_pool2d_ref(x, s).reshape(N, C, -1) for s in sizes]
    return jnp.concatenate(priors, axis=-1)


# ---------------------------------- main ----------------------------------- #
if __name__ == "__main__":
    N, C, H, W = 2, 4, 16, 16
    x = jax.random.normal(jax.random.PRNGKey(0), (N, C, H, W), jnp.float32)

    out = jax.block_until_ready(spp_block(x))
    ref = jax.block_until_ready(spp_block_ref(x))

    K_total = sum(s * s for s in SPP_SIZES)
    assert out.shape == (N, C, K_total), out.shape
    np.testing.assert_allclose(np.asarray(out), np.asarray(ref),
                               rtol=2e-3, atol=2e-3)
    print("KERNEL_OK")
</pallas_src>

<mosaic_0001>
module attributes {stable_mosaic.version = 11 : i64} {
  func.func @_spp_kernel(%arg0: i32, %arg1: memref<1x4x256xf32, #tpu.memory_space<vmem>>, %arg2: memref<256x110xf32, #tpu.memory_space<vmem>>, %arg3: memref<1x4x110xf32, #tpu.memory_space<vmem>>) attributes {dimension_semantics = [#tpu.dimension_semantics<parallel>], iteration_bounds = array<i64: 2>, scalar_prefetch = 0 : i64, scratch_operands = 0 : i64, tpu.core_type = #tpu.core_type<tc>, window_params = [{transform_indices = @transform_0, window_bounds = array<i64: 1, 4, 256>}, {pipeline_mode = #tpu.pipeline_mode<synchronous>, transform_indices = @transform_1, window_bounds = array<i64: 256, 110>}, {transform_indices = @transform_2, window_bounds = array<i64: 1, 4, 110>}]} {
    %c0 = arith.constant 0 : index
    %c0_0 = arith.constant 0 : index
    %c0_1 = arith.constant 0 : index
    %0 = vector.load %arg1[%c0, %c0_0, %c0_1] : memref<1x4x256xf32, #tpu.memory_space<vmem>>, vector<1x4x256xf32>
    %1 = vector.shape_cast %0 : vector<1x4x256xf32> to vector<4x256xf32>
    %c0_2 = arith.constant 0 : index
    %c0_3 = arith.constant 0 : index
    %2 = vector.load %arg2[%c0_2, %c0_3] : memref<256x110xf32, #tpu.memory_space<vmem>>, vector<256x110xf32>
    %cst = arith.constant dense<0.000000e+00> : vector<4x110xf32>
    %3 = tpu.matmul %1, %2, %cst {dimension_numbers = #tpu.dot_dimension_numbers<[1], [0], [0], [1], [0, 0, 1, 1], [], []>} : vector<4x256xf32>, vector<256x110xf32>, vector<4x110xf32> -> vector<4x110xf32>
    %c0_4 = arith.constant 0 : index
    %c0_5 = arith.constant 0 : index
    %c0_6 = arith.constant 0 : index
    %4 = vector.load %arg3[%c0_4, %c0_5, %c0_6] : memref<1x4x110xf32, #tpu.memory_space<vmem>>, vector<1x4x110xf32>
    %5 = vector.shape_cast %4 : vector<1x4x110xf32> to vector<4x110xf32>
    %6 = vector.shape_cast %3 : vector<4x110xf32> to vector<1x4x110xf32>
    tpu.vector_store %arg3[%c0_4, %c0_5, %c0_6], %6 {strides = array<i32>} : memref<1x4x110xf32, #tpu.memory_space<vmem>>, vector<1x4x110xf32>,
    return
  }
  func.func @transform_0(%arg0: i32) -> (i32, i32, i32) {
    %c0_i32 = arith.constant 0 : i32
    %c0_i32_0 = arith.constant 0 : i32
    %c0_i32_1 = arith.constant 0 : i32
    return %arg0, %c0_i32, %c0_i32_0 : i32, i32, i32
  }
  func.func @transform_1(%arg0: i32) -> (i32, i32) {
    %c0_i32 = arith.constant 0 : i32
    %c0_i32_0 = arith.constant 0 : i32
    %c0_i32_1 = arith.constant 0 : i32
    return %c0_i32, %c0_i32_0 : i32, i32
  }
  func.func @transform_2(%arg0: i32) -> (i32, i32, i32) {
    %c0_i32 = arith.constant 0 : i32
    %c0_i32_0 = arith.constant 0 : i32
    %c0_i32_1 = arith.constant 0 : i32
    return %arg0, %c0_i32, %c0_i32_0 : i32, i32, i32
  }
}

</mosaic_0001>

<bundles_post_ra>
// kernel: tpu_custom_call.1
= control target key start
LH: loop header
LB: loop body
LE: loop exit
PB: predicated region body
PF: predicated region fallthrough
CT: control target
= control target key end

     0   :  { %7 = vsyncpa [#allocation3], 0  ;;  %s718_s0 = inlined_call_operand.vmem [shape: f32[2,4,256], index: 0, kind: input, shape index: {}]   ;;  %s719_s1 = inlined_call_operand.vmem [shape: f32[256,110], index: 1, kind: input, shape index: {}]   ;;  %s720_s2 = inlined_call_operand.hbm [shape: f32[2,4,110], index: 2, kind: output, shape index: {}]  }
   0x1   :  { %9 = vsyncpa [#allocation3 + $0x1], 0  ;;  %s522_s9 = smov 0   ;;  %s524_s10 = smov 0  }
   0x2   :  { %s526_s11 = smov 0   ;;  %s528_s12 = smov 0  }
   0x3 LB: > { %s543_s13 = sadd.s32 4294967295, %s504_s12   ;;  %s323_s14 = sadd.s32 4294967294, %s504_s12   ;;  %s504_s12 = sphi %s528_s12, %s726_s12   ;;  %s500_s11 = sphi %s526_s11, %s725_s11   ;;  %s496_s10 = sphi %s524_s10, %s724_s10   ;;  %s492_s9 = sphi %s522_s9, %s723_s9  }
   0x4   : > { %s547_s15 = sadd.s32 1, %s504_s12   ;;  %s69_s16 = sadd.s32 1, %s500_s11 }
   0x5   : > { %s66_s17 = ssub.s32 %s504_s12, %s547_s15  ;;  %p79_p0 = scmp.ne.s32.totalorder %s500_s11, %s496_s10 }
   0x6   : > { %p67_p1 = scmp.eq.s32.totalorder %s66_s17, 0  ;;  %p80_p2 = scmp.eq.s32.totalorder %s543_s13, 1 }
   0x7   : > { %p85_p3 = scmp.ne.s32.totalorder %s496_s10, %s492_s9  ;;  %p86_p4 = scmp.eq.s32.totalorder %s323_s14, 1 }
   0x8   : > { %s558_s18 = scalar_select %p67_p1, %s500_s11, %s69_s16  }
   0x9   : > { %p560_p5 = por %p80_p2, %p79_p0  ;;  %p564_p6 = por %p86_p4, %p85_p3 }
   0xa   : > { %p326_p7 = scmp.ge.s32.totalorder %s504_s12, 1  ;;  %p115_p8 = scmp.lt.s32.totalorder %s504_s12, 3 }
   0xc   : > { %p116_p9 = pnand %p326_p7, %p115_p8 }
   0xd   : > { %v159_v0 = vld [vmem:[%s719_s1 + $0x80] sm:$0xff] (!%p116_p9)  ;;  %v160_v1 = vld [vmem:[%s719_s1 + $0x88] sm:$0xff] (!%p116_p9)  ;;  %p137_p10 = scmp.lt.s32.totalorder (!%p116_p9), %s543_s13, 1  ;;  %v161_v5 = vld [vmem:[%s719_s1 + $0x90] sm:$0xff] (!%p116_p9)  ;;  %s134_s5 = sand.u32 (!%p116_p9), 1, %s496_s10   ;;  %vm248_vm0 = vcmask (!%p116_p9), 896000  }
   0xe   : > { %119 = sbr.rel (%p116_p9) target bundleno = 277 (0x115), region = 28  ;;  %v143_v2 = vld [vmem:[%s719_s1] sm:$0xff] (!%p116_p9)  ;;  %v370_v3 = vpack.c.bf16 (!%p116_p9), %v160_v1, %v159_v0  ;;  %v144_v4 = vld [vmem:[%s719_s1 + $0x8] sm:$0xff] (!%p116_p9)  ;;  %v162_v6 = vld [vmem:[%s719_s1 + $0x98] sm:$0xff] (!%p116_p9)  ;;  %s331_s7 = sshll.u32 (!%p116_p9), %s543_s13, 6 }
   0xf   : > { %v372_v7 = vpack.c.bf16 (!%p116_p9), %v144_v4, %v143_v2  ;;  %v374_v8 = vpack.c.bf16 (!%p116_p9), %v162_v6, %v161_v5  ;;  %v145_v9 = vld [vmem:[%s719_s1 + $0x10] sm:$0xff] (!%p116_p9)  ;;  %v146_v10 = vld [vmem:[%s719_s1 + $0x18] sm:$0xff] (!%p116_p9)  ;;  %v163_v11 = vld [vmem:[%s719_s1 + $0xa0] sm:$0xff] (!%p116_p9)  ;;  %s676_s21 = scalar_lea.hbm (!%p116_p9), %s720_s2, %s331_s7  ;;  %s251_s22 = scalar_lea.sflag (!%p116_p9), [#allocation3], %s134_s5 }
  0x10   : > { %371 = vmatprep.subr.bf16.mxu0 (!%p116_p9), %v370_v3  ;;  %v164_v12 = vld [vmem:[%s719_s1 + $0xa8] sm:$0xff] (!%p116_p9)  ;;  %v376_v13 = vpack.c.bf16 (!%p116_p9), %v146_v10, %v145_v9  ;;  %v147_v15 = vld [vmem:[%s719_s1 + $0x20] sm:$0xff] (!%p116_p9)  ;;  %v165_v17 = vld [vmem:[%s719_s1 + $0xb0] sm:$0xff] (!%p116_p9) }
  0x11   : > { %373 = vmatpush3.bf16.msra.mxu0 (!%p116_p9), %v372_v7  ;;  %v378_v14 = vpack.c.bf16 (!%p116_p9), %v164_v12, %v163_v11  ;;  %v148_v16 = vld [vmem:[%s719_s1 + $0x28] sm:$0xff] (!%p116_p9)  ;;  %v166_v18 = vld [vmem:[%s719_s1 + $0xb8] sm:$0xff] (!%p116_p9)  ;;  %v149_v21 = vld [vmem:[%s719_s1 + $0x30] sm:$0xff] (!%p116_p9) }
  0x12   : > { %375 = vmatprep.subr.bf16.mxu0 (!%p116_p9), %v374_v8  ;;  %v380_v19 = vpack.c.bf16 (!%p116_p9), %v148_v16, %v147_v15  ;;  %v382_v20 = vpack.c.bf16 (!%p116_p9), %v166_v18, %v165_v17  ;;  %v150_v22 = vld [vmem:[%s719_s1 + $0x38] sm:$0xff] (!%p116_p9)  ;;  %v167_v23 = vld [vmem:[%s719_s1 + $0xc0] sm:$0xff] (!%p116_p9)  ;;  %v168_v24 = vld [vmem:[%s719_s1 + $0xc8] sm:$0xff] (!%p116_p9) }
  0x13   : > { %v384_v27 = vpack.c.bf16 (!%p116_p9), %v150_v22, %v149_v21  ;;  %v386_v28 = vpack.c.bf16 (!%p116_p9), %v168_v24, %v167_v23  ;;  %v151_v29 = vld [vmem:[%s719_s1 + $0x40] sm:$0xff] (!%p116_p9)  ;;  %v152_v30 = vld [vmem:[%s719_s1 + $0x48] sm:$0xff] (!%p116_p9)  ;;  %v169_v31 = vld [vmem:[%s719_s1 + $0xd0] sm:$0xff] (!%p116_p9) }
  0x14   : > { %v170_v32 = vld [vmem:[%s719_s1 + $0xd8] sm:$0xff] (!%p116_p9)  ;;  %v388_v33 = vpack.c.bf16 (!%p116_p9), %v152_v30, %v151_v29  ;;  %v153_v35 = vld [vmem:[%s719_s1 + $0x50] sm:$0xff] (!%p116_p9)  ;;  %v171_v37 = vld [vmem:[%s719_s1 + $0xe0] sm:$0xff] (!%p116_p9) }
  0x15   : > { %s138_s17 = scalar_select %p137_p10, %s543_s13, 1  ;;  %377 = vmatpush3.bf16.msra.mxu0 %v376_v13  ;;  %v390_v34 = vpack.c.bf16 %v170_v32, %v169_v31  ;;  %v154_v36 = vld [vmem:[%s719_s1 + $0x58] sm:$0xff]  ;;  %v172_v38 = vld [vmem:[%s719_s1 + $0xe8] sm:$0xff]  ;;  %v155_v41 = vld [vmem:[%s719_s1 + $0x60] sm:$0xff] }
  0x16   : > { %379 = vmatprep.subr.bf16.mxu0 %v378_v14  ;;  %v392_v39 = vpack.c.bf16 %v154_v36, %v153_v35  ;;  %v394_v40 = vpack.c.bf16 %v172_v38, %v171_v37  ;;  %v156_v42 = vld [vmem:[%s719_s1 + $0x68] sm:$0xff]  ;;  %v173_v43 = vld [vmem:[%s719_s1 + $0xf0] sm:$0xff]  ;;  %v174_v44 = vld [vmem:[%s719_s1 + $0xf8] sm:$0xff]  ;;  %s506_s13 = smov [#allocation2]  }
  0x17   : > { %s334_s23 = sshll.u32 %s138_s17, 3  ;;  %v396_v45 = vpack.c.bf16 %v156_v42, %v155_v41  ;;  %v398_v46 = vpack.c.bf16 %v174_v44, %v173_v43  ;;  %v157_v47 = vld [vmem:[%s719_s1 + $0x70] sm:$0xff]  ;;  %v158_v48 = vld [vmem:[%s719_s1 + $0x78] sm:$0xff] }
  0x18   : > { %s141_s6 = scalar_lea.vmem %s718_s0, %s334_s23  ;;  %v400_v49 = vpack.c.bf16 %v158_v48, %v157_v47  ;;  %s446_s23 = sshll.u32 %s506_s13, 4  ;;  %s447_s23 = int_to_ptr.vmem [resolvable:$false] %s446_s23 }
  0x19   : > { %v142_v25 = vld [vmem:[%s141_s6] sm:$0xff]  ;;  %381 = vmatpush3.bf16.msra.mxu0 %v380_v19  ;;  %s327_s6 = sshll.u32 %s134_s5, 2  ;;  %s448_s25 = scalar_lea.vmem %s447_s23, 128 }
  0x1a   : > { %v176_v26 = vcombine.high %v142_v25, %v142_v25  ;;  %383 = vmatprep.subr.bf16.mxu0 %v382_v20  ;;  %s136_s8 = scalar_lea.vmem [#allocation2], %s327_s6 }
  0x1b   : > { %s264_s14 = sshll.u32 %s136_s8, 4  ;;  %s678_s14 = int_to_ptr.vmem [resolvable:$true] %s264_s14 }
  0x1c   : > { %242 = vmatprep.mubr.f32.mxu0 %v176_v26  ;;  %s442_s24 = scalar_lea.vmem %s678_s14, 64  ;;  %p449_p0 = scmp.lt.s32.totalorder %s678_s14, %s447_s23 }
  0x1d   : > { %385 = vmatpush3.bf16.msra.mxu0 %v384_v27  ;;  %p443_p11 = scmp.ne.s32.totalorder %s678_s14, %s442_s24  ;;  %p450_p1 = scmp.lt.s32.totalorder %s448_s25, %s442_s24 }
  0x1e   : > { %387 = vmatprep.subr.bf16.mxu0 %v386_v28 }
  0x1f   : > { %p444_p12 = pnand %p443_p11, %p560_p5  ;;  %p451_p2 = por %p450_p1, %p449_p0 }
  0x21   : > { %389 = vmatpush3.bf16.msra.mxu0 %v388_v33  ;;  %p445_p13 = pneg %p444_p12 }
  0x22   : > { %391 = vmatprep.subr.bf16.mxu0 %v390_v34 }
  0x23   : > { %p452_p3 = pnand %p451_p2, %p445_p13 }
  0x25   : > { %393 = vmatpush3.bf16.msra.mxu0 %v392_v39 }
  0x26   : > { %395 = vmatprep.subr.bf16.mxu0 %v394_v40 }
  0x29   : > { %397 = vmatpush3.bf16.msra.mxu0 %v396_v45 }
  0x2a   : > { %399 = vmatprep.subr.bf16.mxu0 %v398_v46 }
  0x2d   : > { %401 = vmatpush3.bf16.msra.mxu0 %v400_v49 }
  0x30   : > { %243 = vmatmul.mubr.f32.vlgmr.msra.gmra.mrb[0].mxu0 %v142_v25 }
 0x103   : > { %v367_v50 = vpop.f32.mrb[0].mxu0 }
 0x104   : > { %v368_v51 = vpop.f32.mrb[1].mxu0 }
 0x105   : > { %v369_v52 = vadd.f32 %v368_v51, %v367_v50 }
 0x107   : > { %249 = vst.msk [vmem:[%s136_s8] sm:$0xf] %vm248_vm0, %v369_v52 }
 0x108   : > { %455 = shalt.err (!%p452_p3)
}
 0x109   : > { %s456_s26 = scalar_lea.hbm %s676_s21, 64  ;;  %s460_s29 = scalar_lea.hbm %s720_s2, 128 }
 0x10a   : > { %p457_p4 = scmp.ne.s32.totalorder %s676_s21, %s456_s26  ;;  %p461_p9 = scmp.lt.u32.totalorder %s676_s21, %s720_s2 }
 0x10b   : > { %p462_p10 = scmp.lt.u32.totalorder %s460_s29, %s456_s26  ;;  %p464_p12 = scmp.lt.u32.totalorder %s456_s26, %s676_s21 }
 0x10c   : > { %p458_p7 = pnand %p457_p4, %p560_p5 }
 0x10d   : > { %p463_p11 = por %p462_p10, %p461_p9 }
 0x10e   : > { %p459_p8 = pneg %p458_p7 }
 0x10f   : > { %p465_p13 = por %p464_p12, %p463_p11 }
 0x111   : > { %p466_p0 = pnand %p465_p13, %p459_p8 }
 0x113   : > { %469 = shalt.err (!%p466_p0)
}
 0x114   : > { %402 = dma.vmem_to_hbm [thread:$0]  (%p560_p5), %s678_s14, 64, %s676_s21, %s251_s22  }
 0x115 PF: > { %p408_p1 = scmp.ge.s32.totalorder %s504_s12, 2  ;;  %s276_s4 = sand.u32 1, %s492_s9  }
 0x116   : > { %s277_s5 = scalar_lea.sflag [#allocation3], %s276_s4 }
 0x117   : > { %p405_p2 = pnand %p408_p1, %p564_p6 }
 0x119   : > { %487 = dma.done.wait (!%p405_p2), %s277_s5, 64  }
 0x11a   : > { %489 = vsyncadd (!%p405_p2), %s277_s5, 4294967232  ;;  %p12_p3 = scmp.ge.s32.totalorder %s547_s15, 4   ;;  %s723_s9 = smov %s496_s10 }
 0x11b   : > { %s724_s10 = smov %s500_s11  ;;  %s725_s11 = smov %s558_s18 }
 0x11c   : > { %s726_s12 = smov %s547_s15  ;;  %14 = sbr.rel (!%p12_p3) target bundleno = 3 (0x3), region = 63 }
 0x123   :  { %282 = vsyncpa [#allocation3], 1 }
 0x124   :  { %284 = vsyncpa [#allocation3 + $0x1], 1 }

</bundles_post_ra>
